<compile_context>
chip_gen: v6e
topology: v6e:2x2x1
jax: 0.10.0
libtpu: 0.0.40
codegen_flags: <defaults>
</compile_context>

<pallas_src>
import jax
import jax.numpy as jnp
from jax.experimental import pallas as pl
from jax.experimental.pallas import tpu as pltpu

EPS = 1e-5          # nn.BatchNorm2d default eps (constructor eps=2e-5 is unused by bn)
LEAKY_SLOPE = 0.2


def _round_up(x, m):
    return (x + m - 1) // m * m


def _mlp(z, w1, b1, w2):
    # Linear(dim_in -> C, bias) -> LeakyReLU(0.2) -> Linear(C -> C, no bias)
    h = jnp.dot(z, w1, preferred_element_type=jnp.float32) + b1
    h = jnp.where(h >= 0, h, LEAKY_SLOPE * h)
    return jnp.dot(h, w2, preferred_element_type=jnp.float32)


def _stats_kernel(x_ref, sum_ref, sq_ref):
    # Fused single-pass sum / sum-of-squares per (n,c) row, accumulated over
    # spatial tiles (output block resident across the reduction axis).
    @pl.when(pl.program_id(1) == 0)
    def _():
        sum_ref[...] = jnp.zeros_like(sum_ref)
        sq_ref[...] = jnp.zeros_like(sq_ref)

    x = x_ref[...]
    sum_ref[...] += jnp.sum(x, axis=1, keepdims=True)
    sq_ref[...] += jnp.sum(x * x, axis=1, keepdims=True)


def _apply_kernel(x_ref, scale_ref, shift_ref, out_ref):
    # Hoisted affine: one multiply + one add per element.
    out_ref[...] = x_ref[...] * scale_ref[...] + shift_ref[...]


def batch_norm_modulate_2d(x, z, params):
    """x: (N, C, H, W) f32, z: (N, dim_in) f32 -> (N, C, H, W) f32."""
    N, C, H, W = x.shape
    HW = H * W
    R = N * C
    count = N * HW
    inv_count = 1.0 / float(count)

    # Tile sizes: lane-dense spatial tiles (128..2048), 8-aligned row tiles.
    hw_blk = min(_round_up(HW, 128), 2048)
    row_blk = min(_round_up(R, 8), 128)
    HW_pad = _round_up(HW, hw_blk)
    R_pad = _round_up(R, row_blk)

    # Lane-dense 2D view; zero padding does not perturb sums / sum-of-squares.
    x2 = jnp.pad(x.reshape(R, HW), ((0, R_pad - R), (0, HW_pad - HW)))

    grid = (R_pad // row_blk, HW_pad // hw_blk)
    tile_bytes = row_blk * hw_blk * 4
    # x tile + out tile, double-buffered, plus headroom; well under v7x's 64 MiB VMEM.
    vmem_limit = min(max(4 * tile_bytes + (4 << 20), 16 << 20), 48 << 20)

    # ---- Pass 1: per-(n,c) sum and sum-of-squares -------------------------------
    sums, sqs = pl.pallas_call(
        _stats_kernel,
        out_shape=(jax.ShapeDtypeStruct((R_pad, 1), jnp.float32),
                   jax.ShapeDtypeStruct((R_pad, 1), jnp.float32)),
        grid=grid,
        in_specs=[pl.BlockSpec((row_blk, hw_blk), lambda r, h: (r, h))],
        out_specs=(pl.BlockSpec((row_blk, 1), lambda r, h: (r, 0)),
                   pl.BlockSpec((row_blk, 1), lambda r, h: (r, 0))),
        compiler_params=pltpu.CompilerParams(
            dimension_semantics=("parallel", "arbitrary"),
            vmem_limit_bytes=vmem_limit),
    )(x2)

    sum_nc = sums[:R].reshape(N, C)
    sq_nc = sqs[:R].reshape(N, C)

    # ---- Pass 2: tiny kernel — MLPs + stats finalize -> per-(n,c) scale/shift ----
    def _modulate_kernel(z_ref, w1g_ref, b1g_ref, w2g_ref,
                         w1b_ref, b1b_ref, w2b_ref,
                         sum_ref, sq_ref, scale_ref, shift_ref):
        zz = z_ref[...]                                                   # (N, dim_in)
        gamma = _mlp(zz, w1g_ref[...], b1g_ref[...], w2g_ref[...])        # (N, C)
        beta = _mlp(zz, w1b_ref[...], b1b_ref[...], w2b_ref[...])         # (N, C)

        mean = jnp.sum(sum_ref[...], axis=0, keepdims=True) * inv_count   # (1, C)
        ex2 = jnp.sum(sq_ref[...], axis=0, keepdims=True) * inv_count
        # Biased variance via E[x^2] - mean^2 (single pass over x). If precision on
        # large-magnitude/low-variance channels ever matters, fall back to two-pass.
        var = ex2 - mean * mean
        inv_std = jax.lax.rsqrt(var + EPS)                                # EUP, (1, C)

        scale = gamma * inv_std
        scale_ref[...] = scale
        shift_ref[...] = beta - mean * scale

    vmem = pl.BlockSpec(memory_space=pltpu.MemorySpace.VMEM)
    scale, shift = pl.pallas_call(
        _modulate_kernel,
        out_shape=(jax.ShapeDtypeStruct((N, C), jnp.float32),
                   jax.ShapeDtypeStruct((N, C), jnp.float32)),
        in_specs=[vmem] * 9,
        out_specs=(vmem, vmem),
    )(z, params["w1g"], params["b1g"], params["w2g"],
      params["w1b"], params["b1b"], params["w2b"], sum_nc, sq_nc)

    scale_r = jnp.pad(scale.reshape(R, 1), ((0, R_pad - R), (0, 0)))
    shift_r = jnp.pad(shift.reshape(R, 1), ((0, R_pad - R), (0, 0)))

    # ---- Pass 3: out = scale * x + shift (memory-bound, fully parallel) ----------
    out_pad = pl.pallas_call(
        _apply_kernel,
        out_shape=jax.ShapeDtypeStruct((R_pad, HW_pad), jnp.float32),
        grid=grid,
        in_specs=[pl.BlockSpec((row_blk, hw_blk), lambda r, h: (r, h)),
                  pl.BlockSpec((row_blk, 1), lambda r, h: (r, 0)),
                  pl.BlockSpec((row_blk, 1), lambda r, h: (r, 0))],
        out_specs=pl.BlockSpec((row_blk, hw_blk), lambda r, h: (r, h)),
        compiler_params=pltpu.CompilerParams(
            dimension_semantics=("parallel", "parallel"),
            vmem_limit_bytes=vmem_limit),
    )(x2, scale_r, shift_r)

    return out_pad[:R, :HW].reshape(N, C, H, W)


def _reference(x, z, params):
    # Pure-JAX reference of the same forward pass (two-pass variance).
    mean = jnp.mean(x, axis=(0, 2, 3), keepdims=True)
    var = jnp.mean((x - mean) ** 2, axis=(0, 2, 3), keepdims=True)
    x_hat = (x - mean) / jnp.sqrt(var + EPS)

    def mlp(z, w1, b1, w2):
        h = z @ w1 + b1
        h = jnp.where(h >= 0, h, LEAKY_SLOPE * h)
        return h @ w2

    gamma = mlp(z, params["w1g"], params["b1g"], params["w2g"])
    beta = mlp(z, params["w1b"], params["b1b"], params["w2b"])
    return gamma[:, :, None, None] * x_hat + beta[:, :, None, None]


if __name__ == "__main__":
    N, C, H, W, DIM_IN = 2, 4, 16, 16, 32

    key = jax.random.PRNGKey(0)
    keys = jax.random.split(key, 8)

    def lin_init(k, fan_in, shape):
        # Deterministic PyTorch-style Linear init: U(-1/sqrt(fan_in), 1/sqrt(fan_in)).
        bound = 1.0 / float(fan_in) ** 0.5
        return jax.random.uniform(k, shape, jnp.float32, -bound, bound)

    params = {
        "w1g": lin_init(keys[0], DIM_IN, (DIM_IN, C)),
        "b1g": lin_init(keys[1], DIM_IN, (1, C)),
        "w2g": lin_init(keys[2], C, (C, C)),
        "w1b": lin_init(keys[3], DIM_IN, (DIM_IN, C)),
        "b1b": lin_init(keys[4], DIM_IN, (1, C)),
        "w2b": lin_init(keys[5], C, (C, C)),
    }

    x = jax.random.normal(keys[6], (N, C, H, W), jnp.float32)
    z = jax.random.normal(keys[7], (N, DIM_IN), jnp.float32)

    fwd = jax.jit(batch_norm_modulate_2d)
    out = fwd(x, z, params)
    jax.block_until_ready(out)

    ref = _reference(x, z, params)
    assert out.shape == (N, C, H, W)
    assert jnp.allclose(out, ref, atol=2e-4, rtol=2e-4)

    print("KERNEL_OK")
</pallas_src>

<mosaic_0001>
module attributes {stable_mosaic.version = 11 : i64} {
  func.func @_stats_kernel(%arg0: i32, %arg1: i32, %arg2: memref<8x256xf32, #tpu.memory_space<vmem>>, %arg3: memref<8x1xf32, #tpu.memory_space<vmem>>, %arg4: memref<8x1xf32, #tpu.memory_space<vmem>>) attributes {dimension_semantics = [#tpu.dimension_semantics<parallel>, #tpu.dimension_semantics<arbitrary>], iteration_bounds = array<i64: 1, 1>, scalar_prefetch = 0 : i64, scratch_operands = 0 : i64, tpu.core_type = #tpu.core_type<tc>, window_params = [{transform_indices = @transform_0, window_bounds = array<i64: 8, 256>}, {transform_indices = @transform_1, window_bounds = array<i64: 8, 1>}, {transform_indices = @transform_2, window_bounds = array<i64: 8, 1>}]} {
    %c0_i32 = arith.constant 0 : i32
    %0 = arith.cmpi eq, %arg1, %c0_i32 : i32
    %1 = arith.extui %0 : i1 to i32
    %c0_i32_0 = arith.constant 0 : i32
    %2 = arith.cmpi ne, %1, %c0_i32_0 : i32
    scf.if %2 {
      %cst_11 = arith.constant 0.000000e+00 : f32
      %15 = vector.broadcast %cst_11 : f32 to vector<8x1xf32>
      %c0_12 = arith.constant 0 : index
      %c0_13 = arith.constant 0 : index
      %16 = vector.load %arg3[%c0_12, %c0_13] : memref<8x1xf32, #tpu.memory_space<vmem>>, vector<8x1xf32>
      tpu.vector_store %arg3[%c0_12, %c0_13], %15 {strides = array<i32>} : memref<8x1xf32, #tpu.memory_space<vmem>>, vector<8x1xf32>,
      %cst_14 = arith.constant 0.000000e+00 : f32
      %17 = vector.broadcast %cst_14 : f32 to vector<8x1xf32>
      %c0_15 = arith.constant 0 : index
      %c0_16 = arith.constant 0 : index
      %18 = vector.load %arg4[%c0_15, %c0_16] : memref<8x1xf32, #tpu.memory_space<vmem>>, vector<8x1xf32>
      tpu.vector_store %arg4[%c0_15, %c0_16], %17 {strides = array<i32>} : memref<8x1xf32, #tpu.memory_space<vmem>>, vector<8x1xf32>,
    } else {
    }
    %c0 = arith.constant 0 : index
    %c0_1 = arith.constant 0 : index
    %3 = vector.load %arg2[%c0, %c0_1] : memref<8x256xf32, #tpu.memory_space<vmem>>, vector<8x256xf32>
    %c0_2 = arith.constant 0 : index
    %c0_3 = arith.constant 0 : index
    %4 = vector.load %arg3[%c0_2, %c0_3] : memref<8x1xf32, #tpu.memory_space<vmem>>, vector<8x1xf32>
    %cst = arith.constant dense<0.000000e+00> : vector<8xf32>
    %5 = vector.multi_reduction <add>, %3, %cst [1] : vector<8x256xf32> to vector<8xf32>
    %6 = vector.shape_cast %5 : vector<8xf32> to vector<8x1xf32>
    %7 = arith.addf %4, %6 : vector<8x1xf32>
    %c0_4 = arith.constant 0 : index
    %c0_5 = arith.constant 0 : index
    %8 = vector.load %arg3[%c0_4, %c0_5] : memref<8x1xf32, #tpu.memory_space<vmem>>, vector<8x1xf32>
    tpu.vector_store %arg3[%c0_4, %c0_5], %7 {strides = array<i32>} : memref<8x1xf32, #tpu.memory_space<vmem>>, vector<8x1xf32>,
    %c0_6 = arith.constant 0 : index
    %c0_7 = arith.constant 0 : index
    %9 = vector.load %arg4[%c0_6, %c0_7] : memref<8x1xf32, #tpu.memory_space<vmem>>, vector<8x1xf32>
    %10 = arith.mulf %3, %3 : vector<8x256xf32>
    %cst_8 = arith.constant dense<0.000000e+00> : vector<8xf32>
    %11 = vector.multi_reduction <add>, %10, %cst_8 [1] : vector<8x256xf32> to vector<8xf32>
    %12 = vector.shape_cast %11 : vector<8xf32> to vector<8x1xf32>
    %13 = arith.addf %9, %12 : vector<8x1xf32>
    %c0_9 = arith.constant 0 : index
    %c0_10 = arith.constant 0 : index
    %14 = vector.load %arg4[%c0_9, %c0_10] : memref<8x1xf32, #tpu.memory_space<vmem>>, vector<8x1xf32>
    tpu.vector_store %arg4[%c0_9, %c0_10], %13 {strides = array<i32>} : memref<8x1xf32, #tpu.memory_space<vmem>>, vector<8x1xf32>,
    return
  }
  func.func @transform_0(%arg0: i32, %arg1: i32) -> (i32, i32) {
    %c0_i32 = arith.constant 0 : i32
    return %arg0, %arg1 : i32, i32
  }
  func.func @transform_1(%arg0: i32, %arg1: i32) -> (i32, i32) {
    %c0_i32 = arith.constant 0 : i32
    %c0_i32_0 = arith.constant 0 : i32
    return %arg0, %c0_i32 : i32, i32
  }
  func.func @transform_2(%arg0: i32, %arg1: i32) -> (i32, i32) {
    %c0_i32 = arith.constant 0 : i32
    %c0_i32_0 = arith.constant 0 : i32
    return %arg0, %c0_i32 : i32, i32
  }
}

module attributes {stable_mosaic.version = 11 : i64} {
  func.func @_modulate_kernel(%arg0: memref<2x32xf32, #tpu.memory_space<vmem>>, %arg1: memref<32x4xf32, #tpu.memory_space<vmem>>, %arg2: memref<1x4xf32, #tpu.memory_space<vmem>>, %arg3: memref<4x4xf32, #tpu.memory_space<vmem>>, %arg4: memref<32x4xf32, #tpu.memory_space<vmem>>, %arg5: memref<1x4xf32, #tpu.memory_space<vmem>>, %arg6: memref<4x4xf32, #tpu.memory_space<vmem>>, %arg7: memref<2x4xf32, #tpu.memory_space<vmem>>, %arg8: memref<2x4xf32, #tpu.memory_space<vmem>>, %arg9: memref<2x4xf32, #tpu.memory_space<vmem>>, %arg10: memref<2x4xf32, #tpu.memory_space<vmem>>) attributes {dimension_semantics = [], scalar_prefetch = 0 : i64, scratch_operands = 0 : i64, tpu.core_type = #tpu.core_type<tc>} {
    %c0 = arith.constant 0 : index
    %c0_0 = arith.constant 0 : index
    %0 = vector.load %arg0[%c0, %c0_0] : memref<2x32xf32, #tpu.memory_space<vmem>>, vector<2x32xf32>
    %c0_1 = arith.constant 0 : index
    %c0_2 = arith.constant 0 : index
    %1 = vector.load %arg1[%c0_1, %c0_2] : memref<32x4xf32, #tpu.memory_space<vmem>>, vector<32x4xf32>
    %c0_3 = arith.constant 0 : index
    %c0_4 = arith.constant 0 : index
    %2 = vector.load %arg2[%c0_3, %c0_4] : memref<1x4xf32, #tpu.memory_space<vmem>>, vector<1x4xf32>
    %c0_5 = arith.constant 0 : index
    %c0_6 = arith.constant 0 : index
    %3 = vector.load %arg3[%c0_5, %c0_6] : memref<4x4xf32, #tpu.memory_space<vmem>>, vector<4x4xf32>
    %cst = arith.constant dense<0.000000e+00> : vector<2x4xf32>
    %4 = tpu.matmul %0, %1, %cst {dimension_numbers = #tpu.dot_dimension_numbers<[1], [0], [0], [1], [0, 0, 1, 1], [], []>} : vector<2x32xf32>, vector<32x4xf32>, vector<2x4xf32> -> vector<2x4xf32>
    %5 = vector.broadcast %2 : vector<1x4xf32> to vector<2x4xf32>
    %6 = arith.addf %4, %5 : vector<2x4xf32>
    %cst_7 = arith.constant 0.000000e+00 : f32
    %7 = vector.broadcast %cst_7 : f32 to vector<2x4xf32>
    %8 = arith.cmpf oge, %6, %7 : vector<2x4xf32>
    %cst_8 = arith.constant 2.000000e-01 : f32
    %9 = vector.broadcast %cst_8 : f32 to vector<2x4xf32>
    %10 = arith.mulf %9, %6 : vector<2x4xf32>
    %11 = arith.select %8, %6, %10 : vector<2x4xi1>, vector<2x4xf32>
    %cst_9 = arith.constant dense<0.000000e+00> : vector<2x4xf32>
    %12 = tpu.matmul %11, %3, %cst_9 {dimension_numbers = #tpu.dot_dimension_numbers<[1], [0], [0], [1], [0, 0, 1, 1], [], []>} : vector<2x4xf32>, vector<4x4xf32>, vector<2x4xf32> -> vector<2x4xf32>
    %c0_10 = arith.constant 0 : index
    %c0_11 = arith.constant 0 : index
    %13 = vector.load %arg4[%c0_10, %c0_11] : memref<32x4xf32, #tpu.memory_space<vmem>>, vector<32x4xf32>
    %c0_12 = arith.constant 0 : index
    %c0_13 = arith.constant 0 : index
    %14 = vector.load %arg5[%c0_12, %c0_13] : memref<1x4xf32, #tpu.memory_space<vmem>>, vector<1x4xf32>
    %c0_14 = arith.constant 0 : index
    %c0_15 = arith.constant 0 : index
    %15 = vector.load %arg6[%c0_14, %c0_15] : memref<4x4xf32, #tpu.memory_space<vmem>>, vector<4x4xf32>
    %cst_16 = arith.constant dense<0.000000e+00> : vector<2x4xf32>
    %16 = tpu.matmul %0, %13, %cst_16 {dimension_numbers = #tpu.dot_dimension_numbers<[1], [0], [0], [1], [0, 0, 1, 1], [], []>} : vector<2x32xf32>, vector<32x4xf32>, vector<2x4xf32> -> vector<2x4xf32>
    %17 = vector.broadcast %14 : vector<1x4xf32> to vector<2x4xf32>
    %18 = arith.addf %16, %17 : vector<2x4xf32>
    %cst_17 = arith.constant 0.000000e+00 : f32
    %19 = vector.broadcast %cst_17 : f32 to vector<2x4xf32>
    %20 = arith.cmpf oge, %18, %19 : vector<2x4xf32>
    %cst_18 = arith.constant 2.000000e-01 : f32
    %21 = vector.broadcast %cst_18 : f32 to vector<2x4xf32>
    %22 = arith.mulf %21, %18 : vector<2x4xf32>
    %23 = arith.select %20, %18, %22 : vector<2x4xi1>, vector<2x4xf32>
    %cst_19 = arith.constant dense<0.000000e+00> : vector<2x4xf32>
    %24 = tpu.matmul %23, %15, %cst_19 {dimension_numbers = #tpu.dot_dimension_numbers<[1], [0], [0], [1], [0, 0, 1, 1], [], []>} : vector<2x4xf32>, vector<4x4xf32>, vector<2x4xf32> -> vector<2x4xf32>
    %c0_20 = arith.constant 0 : index
    %c0_21 = arith.constant 0 : index
    %25 = vector.load %arg7[%c0_20, %c0_21] : memref<2x4xf32, #tpu.memory_space<vmem>>, vector<2x4xf32>
    %cst_22 = arith.constant dense<0.000000e+00> : vector<4xf32>
    %26 = vector.multi_reduction <add>, %25, %cst_22 [0] : vector<2x4xf32> to vector<4xf32>
    %27 = vector.shape_cast %26 : vector<4xf32> to vector<1x4xf32>
    %cst_23 = arith.constant 0.001953125 : f32
    %28 = vector.broadcast %cst_23 : f32 to vector<1x4xf32>
    %29 = arith.mulf %27, %28 : vector<1x4xf32>
    %c0_24 = arith.constant 0 : index
    %c0_25 = arith.constant 0 : index
    %30 = vector.load %arg8[%c0_24, %c0_25] : memref<2x4xf32, #tpu.memory_space<vmem>>, vector<2x4xf32>
    %cst_26 = arith.constant dense<0.000000e+00> : vector<4xf32>
    %31 = vector.multi_reduction <add>, %30, %cst_26 [0] : vector<2x4xf32> to vector<4xf32>
    %32 = vector.shape_cast %31 : vector<4xf32> to vector<1x4xf32>
    %cst_27 = arith.constant 0.001953125 : f32
    %33 = vector.broadcast %cst_27 : f32 to vector<1x4xf32>
    %34 = arith.mulf %32, %33 : vector<1x4xf32>
    %35 = arith.mulf %29, %29 : vector<1x4xf32>
    %36 = arith.subf %34, %35 : vector<1x4xf32>
    %cst_28 = arith.constant 9.99999974E-6 : f32
    %37 = vector.broadcast %cst_28 : f32 to vector<1x4xf32>
    %38 = arith.addf %36, %37 : vector<1x4xf32>
    %39 = math.rsqrt %38 : vector<1x4xf32>
    %40 = vector.broadcast %39 : vector<1x4xf32> to vector<2x4xf32>
    %41 = arith.mulf %12, %40 : vector<2x4xf32>
    %c0_29 = arith.constant 0 : index
    %c0_30 = arith.constant 0 : index
    %42 = vector.load %arg9[%c0_29, %c0_30] : memref<2x4xf32, #tpu.memory_space<vmem>>, vector<2x4xf32>
    tpu.vector_store %arg9[%c0_29, %c0_30], %41 {strides = array<i32>} : memref<2x4xf32, #tpu.memory_space<vmem>>, vector<2x4xf32>,
    %43 = vector.broadcast %29 : vector<1x4xf32> to vector<2x4xf32>
    %44 = arith.mulf %43, %41 : vector<2x4xf32>
    %45 = arith.subf %24, %44 : vector<2x4xf32>
    %c0_31 = arith.constant 0 : index
    %c0_32 = arith.constant 0 : index
    %46 = vector.load %arg10[%c0_31, %c0_32] : memref<2x4xf32, #tpu.memory_space<vmem>>, vector<2x4xf32>
    tpu.vector_store %arg10[%c0_31, %c0_32], %45 {strides = array<i32>} : memref<2x4xf32, #tpu.memory_space<vmem>>, vector<2x4xf32>,
    return
  }
}

module attributes {stable_mosaic.version = 11 : i64} {
  func.func @_apply_kernel(%arg0: i32, %arg1: i32, %arg2: memref<8x256xf32, #tpu.memory_space<vmem>>, %arg3: memref<8x1xf32, #tpu.memory_space<vmem>>, %arg4: memref<8x1xf32, #tpu.memory_space<vmem>>, %arg5: memref<8x256xf32, #tpu.memory_space<vmem>>) attributes {dimension_semantics = [#tpu.dimension_semantics<parallel>, #tpu.dimension_semantics<parallel>], iteration_bounds = array<i64: 1, 1>, scalar_prefetch = 0 : i64, scratch_operands = 0 : i64, tpu.core_type = #tpu.core_type<tc>, window_params = [{transform_indices = @transform_0, window_bounds = array<i64: 8, 256>}, {transform_indices = @transform_1, window_bounds = array<i64: 8, 1>}, {transform_indices = @transform_2, window_bounds = array<i64: 8, 1>}, {transform_indices = @transform_3, window_bounds = array<i64: 8, 256>}]} {
    %c0 = arith.constant 0 : index
    %c0_0 = arith.constant 0 : index
    %0 = vector.load %arg2[%c0, %c0_0] : memref<8x256xf32, #tpu.memory_space<vmem>>, vector<8x256xf32>
    %c0_1 = arith.constant 0 : index
    %c0_2 = arith.constant 0 : index
    %1 = vector.load %arg3[%c0_1, %c0_2] : memref<8x1xf32, #tpu.memory_space<vmem>>, vector<8x1xf32>
    %2 = vector.broadcast %1 : vector<8x1xf32> to vector<8x256xf32>
    %3 = arith.mulf %0, %2 : vector<8x256xf32>
    %c0_3 = arith.constant 0 : index
    %c0_4 = arith.constant 0 : index
    %4 = vector.load %arg4[%c0_3, %c0_4] : memref<8x1xf32, #tpu.memory_space<vmem>>, vector<8x1xf32>
    %5 = vector.broadcast %4 : vector<8x1xf32> to vector<8x256xf32>
    %6 = arith.addf %3, %5 : vector<8x256xf32>
    %c0_5 = arith.constant 0 : index
    %c0_6 = arith.constant 0 : index
    %7 = vector.load %arg5[%c0_5, %c0_6] : memref<8x256xf32, #tpu.memory_space<vmem>>, vector<8x256xf32>
    tpu.vector_store %arg5[%c0_5, %c0_6], %6 {strides = array<i32>} : memref<8x256xf32, #tpu.memory_space<vmem>>, vector<8x256xf32>,
    return
  }
  func.func @transform_0(%arg0: i32, %arg1: i32) -> (i32, i32) {
    %c0_i32 = arith.constant 0 : i32
    return %arg0, %arg1 : i32, i32
  }
  func.func @transform_1(%arg0: i32, %arg1: i32) -> (i32, i32) {
    %c0_i32 = arith.constant 0 : i32
    %c0_i32_0 = arith.constant 0 : i32
    return %arg0, %c0_i32 : i32, i32
  }
  func.func @transform_2(%arg0: i32, %arg1: i32) -> (i32, i32) {
    %c0_i32 = arith.constant 0 : i32
    %c0_i32_0 = arith.constant 0 : i32
    return %arg0, %c0_i32 : i32, i32
  }
  func.func @transform_3(%arg0: i32, %arg1: i32) -> (i32, i32) {
    %c0_i32 = arith.constant 0 : i32
    return %arg0, %arg1 : i32, i32
  }
}

</mosaic_0001>

<bundles_post_ra>
// kernel: batch_norm_modulate_2d.3
= control target key start
LH: loop header
LB: loop body
LE: loop exit
PB: predicated region body
PF: predicated region fallthrough
CT: control target
= control target key end

     0   :  { %vm14_vm0 = vcmask 7168   ;;  %v43_v2 = vmov 0.0   ;;  %s87_s0 = inlined_call_operand.vmem [shape: f32[8,256], index: 0, kind: input, shape index: {}]   ;;  %s88_s1 = inlined_call_operand.vmem [shape: f32[8,1], index: 1, kind: output, shape index: {0}]   ;;  %s89_s2 = inlined_call_operand.vmem [shape: f32[8,1], index: 2, kind: output, shape index: {1}]  }
   0x1   :  { %v17_v0 = vld [vmem:[%s87_s0] sm:$0xff]  ;;  %v18_v1 = vld [vmem:[%s87_s0 + $0x8] sm:$0xff]  ;;  %15 = vst.msk [vmem:[%s88_s1] sm:$0xff] %vm14_vm0, %v43_v2  ;;  %16 = vst.msk [vmem:[%s89_s2] sm:$0xff] %vm14_vm0, %v43_v2 }
   0x2   :  { %v20_v3 = vadd.f32 %v18_v1, %v17_v0  ;;  %v27_v4 = vmul.f32 %v17_v0, %v17_v0  ;;  %v28_v5 = vmul.f32 %v18_v1, %v18_v1 }
   0x4   :  { %21 = vadd.xlane.f32.xlu0 %v20_v3  ;;  %v29_v6 = vadd.f32 %v28_v5, %v27_v4 }
   0x8   :  { %30 = vadd.xlane.f32.xlu0 %v29_v6  ;;  %v19_v7 = vld [vmem:[%s88_s1] sm:$0xff] }
   0x9   :  { %v26_v10 = vld [vmem:[%s89_s2] sm:$0xff] }
  0x8d   :  { %v22_v8 = vpop.xlane.xlu0 %21 }
  0x8e   :  { %v23_v9 = vadd.f32 %v22_v8, %v19_v7 }
  0x90   :  { %25 = vst.msk [vmem:[%s88_s1] sm:$0xff] %vm14_vm0, %v23_v9 }
  0x91   :  { %v31_v11 = vpop.xlane.xlu0 %30 }
  0x92   :  { %v32_v12 = vadd.f32 %v31_v11, %v26_v10 }
  0x94   :  { %33 = vst.msk [vmem:[%s89_s2] sm:$0xff] %vm14_vm0, %v32_v12 }

// kernel: batch_norm_modulate_2d.5
= control target key start
LH: loop header
LB: loop body
LE: loop exit
PB: predicated region body
PF: predicated region fallthrough
CT: control target
= control target key end

     0   :  { %v40_v0 = vmov 0   ;;  %s79_s1 = inlined_call_operand.vmem [shape: f32[8,1], index: 1, kind: input, shape index: {}]   ;;  %s80_s2 = inlined_call_operand.vmem [shape: f32[8,1], index: 2, kind: input, shape index: {}]   ;;  %s81_s0 = inlined_call_operand.vmem [shape: f32[8,256], index: 0, kind: input, shape index: {}]   ;;  %s82_s3 = inlined_call_operand.vmem [shape: f32[8,256], index: 3, kind: output, shape index: {}]  }
   0x1   :  { %39 = vset.pattern.permute.xlu0 %v40_v0  ;;  %v16_v1 = vld [vmem:[%s79_s1] sm:$0xff]  ;;  %v15_v5 = vld [vmem:[%s81_s0 + $0x8] sm:$0xff] }
   0x2   :  { %19 = vperm.xlu0 %39, %v16_v1   ;;  %v24_v2 = vld [vmem:[%s80_s2] sm:$0xff] }
   0x3   :  { %v14_v4 = vld [vmem:[%s81_s0] sm:$0xff] }
   0x6   :  { %27 = vperm.xlu0 %39, %v24_v2  }
  0x7d   :  { %v20_v3 = vpop.permute.xlu0 %19 }
  0x7e   :  { %v22_v6 = vmul.f32 %v20_v3, %v14_v4  ;;  %v23_v7 = vmul.f32 %v20_v3, %v15_v5 }
  0x81   :  { %v28_v8 = vpop.permute.xlu0 %27 }
  0x82   :  { %v30_v9 = vadd.f32 %v28_v8, %v22_v6  ;;  %v31_v10 = vadd.f32 %v28_v8, %v23_v7 }
  0x84   :  { %32 = vst [vmem:[%s82_s3] sm:$0xff] %v30_v9  ;;  %33 = vst [vmem:[%s82_s3 + $0x8] sm:$0xff] %v31_v10 }

// kernel: batch_norm_modulate_2d.4
= control target key start
LH: loop header
LB: loop body
LE: loop exit
PB: predicated region body
PF: predicated region fallthrough
CT: control target
= control target key end

     0   :  { %v457_v0 = vmov 0.0   ;;  %vm458_vm0 = vmmov 0   ;;  %vm47_vm1 = vcmask 261120   ;;  %vm128_vm2 = vcmask 1043456   ;;  %s579_s1 = inlined_call_operand.vmem [shape: f32[32,4], index: 1, kind: input, shape index: {}]   ;;  %s580_s0 = inlined_call_operand.vmem [shape: f32[2,32], index: 0, kind: input, shape index: {}]   ;;  %s581_s3 = inlined_call_operand.vmem [shape: f32[4,4], index: 3, kind: input, shape index: {}]   ;;  %s582_s2 = inlined_call_operand.vmem [shape: f32[1,4], index: 2, kind: input, shape index: {}]   ;;  %s583_s4 = inlined_call_operand.vmem [shape: f32[32,4], index: 4, kind: input, shape index: {}]   ;;  %s584_s6 = inlined_call_operand.vmem [shape: f32[4,4], index: 6, kind: input, shape index: {}]   ;;  %s585_s7 = inlined_call_operand.vmem [shape: f32[2,4], index: 7, kind: input, shape index: {}]   ;;  %s586_s8 = inlined_call_operand.vmem [shape: f32[2,4], index: 8, kind: input, shape index: {}]   ;;  %s587_s9 = inlined_call_operand.vmem [shape: f32[2,4], index: 9, kind: output, shape index: {0}]   ;;  %s588_s5 = inlined_call_operand.vmem [shape: f32[1,4], index: 5, kind: input, shape index: {}]   ;;  %s589_s10 = inlined_call_operand.vmem [shape: f32[2,4], index: 10, kind: output, shape index: {1}]  }
   0x1   :  { %421 = vmatprep.subr.mxu0 %v457_v0  ;;  %v38_v1 = vld [vmem:[%s579_s1 + $0x18] sm:$0xff]  ;;  %v37_v2 = vld [vmem:[%s579_s1 + $0x10] sm:$0xff]  ;;  %429 = vmatprep.mubr.msk.f32.mxu0 %vm458_vm0, %v457_v0  ;;  %v36_v3 = vld [vmem:[%s579_s1 + $0x8] sm:$0xff]  ;;  %vm124_vm4 = vcmask 31744   ;;  %vm364_vm5 = vcmask 25600  }
   0x2   :  { %422 = vmatpush3.msra.mxu0 %v38_v1  ;;  %432 = vmatprep.subr.mxu1 %v457_v0  ;;  %v35_v4 = vld [vmem:[%s579_s1] sm:$0xff]  ;;  %v205_v12 = vld [vmem:[%s583_s4 + $0x18] sm:$0xff]  ;;  %v204_v14 = vld [vmem:[%s583_s4 + $0x10] sm:$0xff] }
   0x3   :  { %423 = vmatprep.subr.mxu0 %v457_v0  ;;  %434 = vmatprep.mubr.msk.f32.mxu1 %vm458_vm0, %v457_v0  ;;  %v34_v5 = vld [vmem:[%s580_s0] sm:$0x3]  ;;  %v203_v15 = vld [vmem:[%s583_s4 + $0x8] sm:$0xff] }
   0x4   :  { %424 = vmatpush3.msra.mxu0 %v37_v2  ;;  %v40_v6 = vld [vmem:[%s581_s3] sm:$0xf] }
   0x5   :  { %425 = vmatprep.subr.mxu0 %v457_v0  ;;  %433 = vmatpush3.msk.msra.mxu1 %vm128_vm2, %v40_v6  ;;  %v399_v7 = vld [vmem:[%s582_s2] ss:$0 sm:$0xff] }
   0x6   :  { %426 = vmatpush3.msra.mxu0 %v36_v3  ;;  %437 = vmatprep.subr.mxu1 %v457_v0  ;;  %v202_v16 = vld [vmem:[%s583_s4] sm:$0xff] }
   0x7   :  { %427 = vmatprep.subr.mxu0 %v457_v0  ;;  %v207_v17 = vld [vmem:[%s584_s6] sm:$0xf] }
   0x8   :  { %428 = vmatpush3.msra.mxu0 %v35_v4  ;;  %v363_v18 = vld [vmem:[%s585_s7] sm:$0x3] }
   0x9   :  { %430 = vmatmul.mubr.msk.f32.vlgmr.msra.gmra.mxu0 %vm47_vm1, %v34_v5  ;;  %448 = vmatprep.subr.mxu0 %v457_v0  ;;  %v365_v19 = vsel %vm364_vm5, %v363_v18, 0.0  ;;  %v373_v20 = vld [vmem:[%s586_s8] sm:$0x3] }
   0xa   :  { %450 = vmatprep.mubr.msk.f32.mxu0 %vm458_vm0, %v457_v0  ;;  %449 = vmatpush3.msk.msra.mxu0 %vm128_vm2, %v207_v17  ;;  %v366_v21 = vrot.slane %v365_v19, 4  ;;  %v374_v22 = vsel %vm364_vm5, %v373_v20, 0.0  ;;  %v403_v43 = vld [vmem:[%s588_s5] ss:$0 sm:$0xff] }
   0xb   :  { %v375_v24 = vrot.slane %v374_v22, 4 }
   0xc   :  { %v367_v23 = vadd.f32 %v366_v21, %v365_v19 }
   0xd   :  { %v376_v26 = vadd.f32 %v375_v24, %v374_v22 }
   0xe   :  { %v368_v25 = vrot.slane %v367_v23, 2 }
   0xf   :  { %v377_v28 = vrot.slane %v376_v26, 2 }
  0x10   :  { %v369_v27 = vadd.f32 %v368_v25, %v367_v23 }
  0x11   :  { %v378_v30 = vadd.f32 %v377_v28, %v376_v26 }
  0x12   :  { %v370_v29 = vrot.slane %v369_v27, 1 }
  0x13   :  { %v379_v32 = vrot.slane %v378_v30, 1 }
  0x14   :  { %v371_v31 = vadd.f32 %v370_v29, %v369_v27 }
  0x15   :  { %v380_v34 = vadd.f32 %v379_v32, %v378_v30 }
  0x16   :  { %v372_v33 = vmul.f32 0.001953125, %v371_v31 }
  0x17   :  { %v381_v35 = vmul.f32 0.001953125, %v380_v34 }
  0x18   :  { %v382_v36 = vmul.f32 %v372_v33, %v372_v33 }
  0x1a   :  { %v383_v37 = vsub.f32 %v381_v35, %v382_v36 }
  0x1c   :  { %v384_v38 = vadd.f32 1e-05, %v383_v37 }
  0x1e   :  { %455 = vrsqrt.f32 %v384_v38 }
  0x2b   :  { %v456_v39 = vpop.eup %455 }
  0xc9   :  { %v117_v8 = vpop.f32.mrf.mxu0 }
  0xca   :  { %v118_v9 = vadd.f32 %v399_v7, %v117_v8 }
  0xcb   :  { %v431_v10 = vpop.f32.mrf.mxu0 }
  0xcc   :  { %vm121_vm3 = vcmp.ge.f32.partialorder %v118_v9, 0.0  ;;  %v122_v11 = vmul.f32 0.2, %v118_v9 }
  0xce   :  { %v123_v13 = vsel %vm121_vm3, %v118_v9, %v122_v11 }
  0xcf   :  { %435 = vmatmul.mubr.msk.f32.vlgmr.msra.gmra.mxu1 %vm124_vm4, %v123_v13 }
  0xd0   :  { %438 = vmatpush3.msra.mxu1 %v205_v12  ;;  %445 = vmatprep.mubr.msk.f32.mxu1 %vm458_vm0, %v457_v0 }
  0xd1   :  { %439 = vmatprep.subr.mxu1 %v457_v0 }
  0xd2   :  { %440 = vmatpush3.msra.mxu1 %v204_v14 }
  0xd3   :  { %441 = vmatprep.subr.mxu1 %v457_v0 }
  0xd4   :  { %442 = vmatpush3.msra.mxu1 %v203_v15 }
  0xd5   :  { %443 = vmatprep.subr.mxu1 %v457_v0 }
  0xd6   :  { %444 = vmatpush3.msra.mxu1 %v202_v16 }
  0xd7   :  { %446 = vmatmul.mubr.msk.f32.vlgmr.msra.gmra.mxu1 %vm47_vm1, %v34_v5 }
 0x18f   :  { %v198_v40 = vpop.f32.mrf.mxu1 }
 0x190   :  { %v386_v41 = vmul.f32 %v456_v39, %v198_v40 }
 0x191   :  { %v436_v42 = vpop.f32.mrf.mxu1 }
 0x192   :  { %387 = vst.msk [vmem:[%s587_s9] sm:$0x3] %vm364_vm5, %v386_v41  ;;  %v388_v49 = vmul.f32 %v386_v41, %v372_v33 }
 0x197   :  { %v280_v44 = vpop.f32.mrf.mxu1 }
 0x198   :  { %v281_v45 = vadd.f32 %v403_v43, %v280_v44 }
 0x199   :  { %v447_v46 = vpop.f32.mrf.mxu1 }
 0x19a   :  { %vm284_vm6 = vcmp.ge.f32.partialorder %v281_v45, 0.0  ;;  %v285_v47 = vmul.f32 0.2, %v281_v45 }
 0x19c   :  { %v286_v48 = vsel %vm284_vm6, %v281_v45, %v285_v47 }
 0x19d   :  { %451 = vmatmul.mubr.msk.f32.vlgmr.msra.gmra.mxu0 %vm124_vm4, %v286_v48 }
 0x25d   :  { %v359_v50 = vpop.f32.mrf.mxu0 }
 0x25e   :  { %v389_v51 = vsub.f32 %v359_v50, %v388_v49 }
 0x25f   :  { %v452_v52 = vpop.f32.mrf.mxu0 }
 0x260   :  { %390 = vst.msk [vmem:[%s589_s10] sm:$0x3] %vm364_vm5, %v389_v51 }

</bundles_post_ra>
